<compile_context>
chip_gen: v6e
topology: v6e:2x2x1
jax: 0.10.0
libtpu: 0.0.40
codegen_flags: <defaults>
</compile_context>

<pallas_src>
import functools
import math

import jax
import jax.numpy as jnp
import numpy as np
from jax import lax
from jax.experimental import pallas as pl
from jax.experimental.pallas import tpu as pltpu

BN_EPS = 1e-5


def _round_up(value, multiple):
    return ((value + multiple - 1) // multiple) * multiple


def _vmem_budget_bytes():
    cap = 128 * 1024 * 1024
    try:
        info = pltpu.get_tpu_info()
        cap = int(getattr(info, "vmem_capacity_bytes", cap) or cap)
    except Exception:
        pass
    if cap <= 64 * 1024 * 1024:          # v7x: leave Mosaic scratch headroom
        return int(cap * 0.80)
    return int(cap * 0.85)               # v5e / v6e: use the 128 MiB


_VMEM_BUDGET = _vmem_budget_bytes()


# ---------------------------------------------------------------------------
# Phase 1: acc += adj_tile(TM,TK) @ x_tile(TK,F_in_p)        (f32 accumulation)
#          at k == last:  out = acc @ W_aug  (bias folded via ones column),
#                         stats = [colsum(out), colsum(out^2)]
# ---------------------------------------------------------------------------
def gcn_agg_kernel(adj_ref, x_ref, w_ref, out_ref, stats_ref, acc_ref):
    k = pl.program_id(1)

    @pl.when(k == 0)
    def _init():
        acc_ref[...] = jnp.zeros_like(acc_ref)

    acc_ref[...] += jnp.dot(adj_ref[...], x_ref[...],
                            preferred_element_type=jnp.float32)

    @pl.when(k == pl.num_programs(1) - 1)
    def _finalize():
        out = jnp.dot(acc_ref[...], w_ref[...],
                      preferred_element_type=jnp.float32)
        out_ref[...] = out
        # Direct sub-row stores (no concatenate / sublane shuffle).
        stats_ref[0, 0:1, :] = jnp.sum(out, axis=0, keepdims=True)
        stats_ref[0, 1:2, :] = jnp.sum(out * out, axis=0, keepdims=True)


# ---------------------------------------------------------------------------
# Phase 2: y = out * scale + shift   (BN folded; in-place on the phase-1 output)
# ---------------------------------------------------------------------------
def bn_apply_kernel(out_ref, scale_ref, shift_ref, y_ref):
    y_ref[...] = out_ref[...] * scale_ref[...] + shift_ref[...]


@functools.partial(jax.jit,
                   static_argnames=("compute_dtype", "tile_rows", "tile_k"))
def gcn_layer(x, adj, w, b, gamma, beta, *,
              compute_dtype=jnp.bfloat16, tile_rows=512, tile_k=1024):
    n, f_in = x.shape
    f_out = w.shape[1]
    cdt = jnp.dtype(compute_dtype)
    bpe = cdt.itemsize
    sub = 8 * (4 // bpe)          # sublane packing: 8 rows f32, 16 rows bf16

    # Lane-dense feature padding; +1 input column carries the folded Linear bias.
    f_in_p = _round_up(f_in + 1, 128)
    f_out_p = _round_up(f_out, 128)

    # Row tiles: aim for >= 2 (ideally 4) tiles so both v7x TensorCores get work;
    # rows are padded only to a multiple of TM.
    if n <= 2 * sub:
        tm = _round_up(max(n, sub), sub)
    else:
        target_tiles = 4 if n >= 4 * sub else 2
        tm = _round_up(min(int(tile_rows), -(-n // target_tiles)), sub)
    n_rows_p = _round_up(n, tm)
    grid_m = n_rows_p // tm

    # K tiling over the adjacency contraction axis; columns padded only to TK.
    tk = min(_round_up(int(tile_k), 128), _round_up(n, 128))
    n_cols_p = _round_up(n, tk)
    grid_k = n_cols_p // tk

    # Adjacency padded straight in the compute dtype (single fused pad+cast pass).
    adj_c = jnp.pad(adj.astype(cdt), ((0, n_rows_p - n), (0, n_cols_p - n)))

    # x with a ones column at index f_in: (adj @ x_aug) picks up rowsum(adj) and
    # row f_in of W_aug carries b, which is exactly adj @ (xW + b).
    x_pad = jnp.zeros((n_cols_p, f_in_p), cdt)
    x_pad = x_pad.at[:n, :f_in].set(x.astype(cdt))
    x_pad = x_pad.at[:n, f_in].set(jnp.ones((n,), cdt))

    # W stays f32 (the second matmul is tiny; keeps the bf16 path accurate).
    w_pad = jnp.zeros((f_in_p, f_out_p), jnp.float32)
    w_pad = w_pad.at[:f_in, :f_out].set(w.astype(jnp.float32))
    w_pad = w_pad.at[f_in, :f_out].set(b.reshape(-1).astype(jnp.float32))

    gamma_p = jnp.pad(gamma.reshape(1, f_out).astype(jnp.float32),
                      ((0, 0), (0, f_out_p - f_out)))
    beta_p = jnp.pad(beta.reshape(1, f_out).astype(jnp.float32),
                     ((0, 0), (0, f_out_p - f_out)))

    # VMEM estimate: every BlockSpec input counted double-buffered, plus scratch.
    est1 = (2 * tm * tk * bpe              # adj tiles
            + 2 * tk * f_in_p * bpe        # x K-slabs
            + 2 * f_in_p * f_out_p * 4     # W (constant block index)
            + 2 * tm * f_out_p * 4         # out tiles
            + 2 * 2 * f_out_p * 4          # stats tiles
            + tm * f_in_p * 4)             # f32 accumulator scratch

    # BN-apply pass gets its own, larger row tile (pure HBM bandwidth).
    tm2 = tm
    while (tm2 * 2 <= 2048 and n_rows_p % (tm2 * 2) == 0
           and n_rows_p // (tm2 * 2) >= 2
           and 4 * (tm2 * 2) * f_out_p * 4 <= _VMEM_BUDGET):
        tm2 *= 2
    grid2 = n_rows_p // tm2
    est2 = 4 * tm2 * f_out_p * 4 + 4 * 2 * f_out_p * 4

    vmem_limit = int(min(_VMEM_BUDGET,
                         max(16 * 1024 * 1024, max(est1, est2) + (8 << 20))))

    flops = 2 * n_rows_p * n_cols_p * f_in_p + 2 * n_rows_p * f_in_p * f_out_p
    bytes_accessed = (n_rows_p * n_cols_p * bpe            # adj streamed once
                      + grid_m * n_cols_p * f_in_p * bpe   # x per row tile
                      + f_in_p * f_out_p * 4
                      + n_rows_p * f_out_p * 4
                      + grid_m * 2 * f_out_p * 4)
    cost = pl.CostEstimate(flops=int(flops), transcendentals=0,
                           bytes_accessed=int(bytes_accessed))

    out_f32, stats = pl.pallas_call(
        gcn_agg_kernel,
        out_shape=(jax.ShapeDtypeStruct((n_rows_p, f_out_p), jnp.float32),
                   jax.ShapeDtypeStruct((grid_m, 2, f_out_p), jnp.float32)),
        grid=(grid_m, grid_k),
        in_specs=[
            pl.BlockSpec((tm, tk), lambda i, k: (i, k)),            # adj tile
            pl.BlockSpec((tk, f_in_p), lambda i, k: (k, 0)),        # x K-slab
            pl.BlockSpec((f_in_p, f_out_p), lambda i, k: (0, 0)),   # W (f32)
        ],
        out_specs=(
            pl.BlockSpec((tm, f_out_p), lambda i, k: (i, 0)),       # out tile
            pl.BlockSpec((1, 2, f_out_p), lambda i, k: (i, 0, 0)),  # BN partials
        ),
        scratch_shapes=[pltpu.VMEM((tm, f_in_p), jnp.float32)],
        compiler_params=pltpu.CompilerParams(
            dimension_semantics=("parallel", "arbitrary"),
            vmem_limit_bytes=vmem_limit),
        cost_estimate=cost,
    )(adj_c, x_pad, w_pad)

    # Tiny finalize: combine per-tile stats (biased variance, true-n divisor),
    # then fold BN into a single scale / shift pair.
    total = jnp.sum(stats, axis=0)                       # (2, f_out_p)
    mean = total[0] / n
    var = jnp.maximum(total[1] / n - mean * mean, 0.0)
    inv_std = lax.rsqrt(var + BN_EPS)
    g = gamma_p.reshape(-1)
    scale = (g * inv_std).reshape(1, f_out_p)
    shift = (beta_p.reshape(-1) - mean * g * inv_std).reshape(1, f_out_p)

    y = pl.pallas_call(
        bn_apply_kernel,
        out_shape=jax.ShapeDtypeStruct((n_rows_p, f_out_p), jnp.float32),
        grid=(grid2,),
        in_specs=[
            pl.BlockSpec((tm2, f_out_p), lambda i: (i, 0)),
            pl.BlockSpec((1, f_out_p), lambda i: (0, 0)),
            pl.BlockSpec((1, f_out_p), lambda i: (0, 0)),
        ],
        out_specs=pl.BlockSpec((tm2, f_out_p), lambda i: (i, 0)),
        input_output_aliases={0: 0},                     # normalize in place
        compiler_params=pltpu.CompilerParams(
            dimension_semantics=("parallel",),
            vmem_limit_bytes=vmem_limit),
    )(out_f32, scale, shift)

    return y[:n, :f_out]


def init_params(key, in_features, out_features):
    # xavier_uniform_ on the Linear weight (torch shape (out, in)); stored
    # pre-transposed as (in, out) so the kernel computes x @ W.
    bound = math.sqrt(6.0 / (in_features + out_features))
    w = jax.random.uniform(key, (in_features, out_features),
                           minval=-bound, maxval=bound, dtype=jnp.float32)
    b = jnp.zeros((1, out_features), dtype=jnp.float32)      # zeros_ init
    gamma = jnp.ones((1, out_features), dtype=jnp.float32)   # BN weight
    beta = jnp.zeros((1, out_features), dtype=jnp.float32)   # BN bias
    return w, b, gamma, beta


def _reference(x, adj, w, b, gamma, beta):
    # float64 NumPy reference of the PyTorch forward (training-mode BN).
    x64 = np.asarray(x, np.float64)
    adj64 = np.asarray(adj, np.float64)
    w64 = np.asarray(w, np.float64)
    b64 = np.asarray(b, np.float64)
    g64 = np.asarray(gamma, np.float64)
    bt64 = np.asarray(beta, np.float64)
    support = x64 @ w64 + b64
    out = adj64 @ support
    mean = out.mean(axis=0, keepdims=True)
    var = ((out - mean) ** 2).mean(axis=0, keepdims=True)
    return (out - mean) / np.sqrt(var + BN_EPS) * g64 + bt64


def _random_graph(key, n, f_in):
    k_adj, k_x = jax.random.split(key)
    x = jax.random.normal(k_x, (n, f_in), dtype=jnp.float32)
    a = (jax.random.uniform(k_adj, (n, n)) > 0.5).astype(jnp.float32)
    a = jnp.maximum(a, a.T) + jnp.eye(n, dtype=jnp.float32)
    adj = a / jnp.sum(a, axis=1, keepdims=True)
    return x, adj


if __name__ == "__main__":
    key = jax.random.PRNGKey(0)
    k_g1, k_g2, k_w = jax.random.split(key, 3)

    F_IN, F_OUT = 16, 32
    w, b, gamma, beta = init_params(k_w, F_IN, F_OUT)

    # Small graph, single row tile / single K tile, exact f32 path.
    N1 = 8
    x1, adj1 = _random_graph(k_g1, N1, F_IN)
    out1 = gcn_layer(x1, adj1, w, b, gamma, beta, compute_dtype=jnp.float32)
    jax.block_until_ready(out1)
    ref1 = _reference(x1, adj1, w, b, gamma, beta)
    assert out1.shape == (N1, F_OUT)
    assert np.allclose(np.asarray(out1), ref1, atol=1e-4, rtol=1e-4)

    # Multi row-tile AND multi K-tile path (grid_m > 1, grid_k > 1), f32, exact.
    N2 = 160
    x2, adj2 = _random_graph(k_g2, N2, F_IN)
    out2 = gcn_layer(x2, adj2, w, b, gamma, beta, compute_dtype=jnp.float32,
                     tile_rows=64, tile_k=128)
    jax.block_until_ready(out2)
    ref2 = _reference(x2, adj2, w, b, gamma, beta)
    assert out2.shape == (N2, F_OUT)
    assert np.allclose(np.asarray(out2), ref2, atol=1e-4, rtol=1e-4)

    # Default path: bf16 adjacency / features on the MXU, f32 accumulation.
    out_bf = gcn_layer(x2, adj2, w, b, gamma, beta)
    jax.block_until_ready(out_bf)
    assert out_bf.shape == (N2, F_OUT)
    assert float(np.max(np.abs(np.asarray(out_bf) - ref2))) < 0.5

    print("KERNEL_OK")
</pallas_src>

<mosaic_0001>
module attributes {stable_mosaic.version = 11 : i64} {
  func.func @gcn_agg_kernel(%arg0: i32, %arg1: i32, %arg2: memref<8x128xf32, #tpu.memory_space<vmem>>, %arg3: memref<128x128xf32, #tpu.memory_space<vmem>>, %arg4: memref<128x128xf32, #tpu.memory_space<vmem>>, %arg5: memref<8x128xf32, #tpu.memory_space<vmem>>, %arg6: memref<1x2x128xf32, #tpu.memory_space<vmem>>, %arg7: memref<8x128xf32, #tpu.memory_space<vmem>>) attributes {dimension_semantics = [#tpu.dimension_semantics<parallel>, #tpu.dimension_semantics<arbitrary>], iteration_bounds = array<i64: 1, 1>, scalar_prefetch = 0 : i64, scratch_operands = 1 : i64, tpu.core_type = #tpu.core_type<tc>, window_params = [{transform_indices = @transform_0, window_bounds = array<i64: 8, 128>}, {transform_indices = @transform_1, window_bounds = array<i64: 128, 128>}, {pipeline_mode = #tpu.pipeline_mode<synchronous>, transform_indices = @transform_2, window_bounds = array<i64: 128, 128>}, {transform_indices = @transform_3, window_bounds = array<i64: 8, 128>}, {transform_indices = @transform_4, window_bounds = array<i64: 1, 2, 128>}]} {
    %c0_i32 = arith.constant 0 : i32
    %0 = arith.cmpi eq, %arg1, %c0_i32 : i32
    %1 = arith.extui %0 : i1 to i32
    %c0_i32_0 = arith.constant 0 : i32
    %2 = arith.cmpi ne, %1, %c0_i32_0 : i32
    scf.if %2 {
      %cst_10 = arith.constant 0.000000e+00 : f32
      %12 = vector.broadcast %cst_10 : f32 to vector<8x128xf32>
      %c0_11 = arith.constant 0 : index
      %c0_12 = arith.constant 0 : index
      %13 = vector.load %arg7[%c0_11, %c0_12] : memref<8x128xf32, #tpu.memory_space<vmem>>, vector<8x128xf32>
      tpu.vector_store %arg7[%c0_11, %c0_12], %12 {strides = array<i32>} : memref<8x128xf32, #tpu.memory_space<vmem>>, vector<8x128xf32>,
    } else {
    }
    %c0 = arith.constant 0 : index
    %c0_1 = arith.constant 0 : index
    %3 = vector.load %arg7[%c0, %c0_1] : memref<8x128xf32, #tpu.memory_space<vmem>>, vector<8x128xf32>
    %c0_2 = arith.constant 0 : index
    %c0_3 = arith.constant 0 : index
    %4 = vector.load %arg2[%c0_2, %c0_3] : memref<8x128xf32, #tpu.memory_space<vmem>>, vector<8x128xf32>
    %c0_4 = arith.constant 0 : index
    %c0_5 = arith.constant 0 : index
    %5 = vector.load %arg3[%c0_4, %c0_5] : memref<128x128xf32, #tpu.memory_space<vmem>>, vector<128x128xf32>
    %cst = arith.constant dense<0.000000e+00> : vector<8x128xf32>
    %6 = tpu.matmul %4, %5, %cst {dimension_numbers = #tpu.dot_dimension_numbers<[1], [0], [0], [1], [0, 0, 1, 1], [], []>} : vector<8x128xf32>, vector<128x128xf32>, vector<8x128xf32> -> vector<8x128xf32>
    %7 = arith.addf %3, %6 : vector<8x128xf32>
    %c0_6 = arith.constant 0 : index
    %c0_7 = arith.constant 0 : index
    %8 = vector.load %arg7[%c0_6, %c0_7] : memref<8x128xf32, #tpu.memory_space<vmem>>, vector<8x128xf32>
    tpu.vector_store %arg7[%c0_6, %c0_7], %7 {strides = array<i32>} : memref<8x128xf32, #tpu.memory_space<vmem>>, vector<8x128xf32>,
    %c0_i32_8 = arith.constant 0 : i32
    %9 = arith.cmpi eq, %arg1, %c0_i32_8 : i32
    %10 = arith.extui %9 : i1 to i32
    %c0_i32_9 = arith.constant 0 : i32
    %11 = arith.cmpi ne, %10, %c0_i32_9 : i32
    scf.if %11 {
      %c0_10 = arith.constant 0 : index
      %c0_11 = arith.constant 0 : index
      %12 = vector.load %arg7[%c0_10, %c0_11] : memref<8x128xf32, #tpu.memory_space<vmem>>, vector<8x128xf32>
      %c0_12 = arith.constant 0 : index
      %c0_13 = arith.constant 0 : index
      %13 = vector.load %arg4[%c0_12, %c0_13] : memref<128x128xf32, #tpu.memory_space<vmem>>, vector<128x128xf32>
      %cst_14 = arith.constant dense<0.000000e+00> : vector<8x128xf32>
      %14 = tpu.matmul %12, %13, %cst_14 {dimension_numbers = #tpu.dot_dimension_numbers<[1], [0], [0], [1], [0, 0, 1, 1], [], []>} : vector<8x128xf32>, vector<128x128xf32>, vector<8x128xf32> -> vector<8x128xf32>
      %c0_15 = arith.constant 0 : index
      %c0_16 = arith.constant 0 : index
      %15 = vector.load %arg5[%c0_15, %c0_16] : memref<8x128xf32, #tpu.memory_space<vmem>>, vector<8x128xf32>
      tpu.vector_store %arg5[%c0_15, %c0_16], %14 {strides = array<i32>} : memref<8x128xf32, #tpu.memory_space<vmem>>, vector<8x128xf32>,
      %cst_17 = arith.constant dense<0.000000e+00> : vector<128xf32>
      %16 = vector.multi_reduction <add>, %14, %cst_17 [0] : vector<8x128xf32> to vector<128xf32>
      %17 = vector.shape_cast %16 : vector<128xf32> to vector<1x128xf32>
      %c0_18 = arith.constant 0 : index
      %c0_19 = arith.constant 0 : index
      %c0_20 = arith.constant 0 : index
      %18 = vector.load %arg6[%c0_18, %c0_19, %c0_20] : memref<1x2x128xf32, #tpu.memory_space<vmem>>, vector<1x1x128xf32>
      %19 = vector.shape_cast %18 : vector<1x1x128xf32> to vector<1x128xf32>
      %20 = vector.shape_cast %17 : vector<1x128xf32> to vector<1x1x128xf32>
      tpu.vector_store %arg6[%c0_18, %c0_19, %c0_20], %20 {strides = array<i32>} : memref<1x2x128xf32, #tpu.memory_space<vmem>>, vector<1x1x128xf32>,
      %21 = arith.mulf %14, %14 : vector<8x128xf32>
      %cst_21 = arith.constant dense<0.000000e+00> : vector<128xf32>
      %22 = vector.multi_reduction <add>, %21, %cst_21 [0] : vector<8x128xf32> to vector<128xf32>
      %23 = vector.shape_cast %22 : vector<128xf32> to vector<1x128xf32>
      %c0_22 = arith.constant 0 : index
      %c1 = arith.constant 1 : index
      %c0_23 = arith.constant 0 : index
      %24 = vector.load %arg6[%c0_22, %c1, %c0_23] : memref<1x2x128xf32, #tpu.memory_space<vmem>>, vector<1x1x128xf32>
      %25 = vector.shape_cast %24 : vector<1x1x128xf32> to vector<1x128xf32>
      %26 = vector.shape_cast %23 : vector<1x128xf32> to vector<1x1x128xf32>
      tpu.vector_store %arg6[%c0_22, %c1, %c0_23], %26 {strides = array<i32>} : memref<1x2x128xf32, #tpu.memory_space<vmem>>, vector<1x1x128xf32>,
    } else {
    }
    return
  }
  func.func @transform_0(%arg0: i32, %arg1: i32) -> (i32, i32) {
    %c0_i32 = arith.constant 0 : i32
    return %arg0, %arg1 : i32, i32
  }
  func.func @transform_1(%arg0: i32, %arg1: i32) -> (i32, i32) {
    %c0_i32 = arith.constant 0 : i32
    %c0_i32_0 = arith.constant 0 : i32
    return %arg1, %c0_i32 : i32, i32
  }
  func.func @transform_2(%arg0: i32, %arg1: i32) -> (i32, i32) {
    %c0_i32 = arith.constant 0 : i32
    %c0_i32_0 = arith.constant 0 : i32
    %c0_i32_1 = arith.constant 0 : i32
    return %c0_i32, %c0_i32_0 : i32, i32
  }
  func.func @transform_3(%arg0: i32, %arg1: i32) -> (i32, i32) {
    %c0_i32 = arith.constant 0 : i32
    %c0_i32_0 = arith.constant 0 : i32
    return %arg0, %c0_i32 : i32, i32
  }
  func.func @transform_4(%arg0: i32, %arg1: i32) -> (i32, i32, i32) {
    %c0_i32 = arith.constant 0 : i32
    %c0_i32_0 = arith.constant 0 : i32
    %c0_i32_1 = arith.constant 0 : i32
    return %arg0, %c0_i32, %c0_i32_0 : i32, i32, i32
  }
}

module attributes {stable_mosaic.version = 11 : i64} {
  func.func @bn_apply_kernel(%arg0: i32, %arg1: memref<8x128xf32, #tpu.memory_space<vmem>>, %arg2: memref<1x128xf32, #tpu.memory_space<vmem>>, %arg3: memref<1x128xf32, #tpu.memory_space<vmem>>, %arg4: memref<8x128xf32, #tpu.memory_space<vmem>>) attributes {dimension_semantics = [#tpu.dimension_semantics<parallel>], iteration_bounds = array<i64: 1>, scalar_prefetch = 0 : i64, scratch_operands = 0 : i64, tpu.core_type = #tpu.core_type<tc>, window_params = [{transform_indices = @transform_0, window_bounds = array<i64: 8, 128>}, {pipeline_mode = #tpu.pipeline_mode<synchronous>, transform_indices = @transform_1, window_bounds = array<i64: 1, 128>}, {pipeline_mode = #tpu.pipeline_mode<synchronous>, transform_indices = @transform_2, window_bounds = array<i64: 1, 128>}, {transform_indices = @transform_3, window_bounds = array<i64: 8, 128>}]} {
    %c0 = arith.constant 0 : index
    %c0_0 = arith.constant 0 : index
    %0 = vector.load %arg1[%c0, %c0_0] : memref<8x128xf32, #tpu.memory_space<vmem>>, vector<8x128xf32>
    %c0_1 = arith.constant 0 : index
    %c0_2 = arith.constant 0 : index
    %1 = vector.load %arg2[%c0_1, %c0_2] : memref<1x128xf32, #tpu.memory_space<vmem>>, vector<1x128xf32>
    %2 = vector.broadcast %1 : vector<1x128xf32> to vector<8x128xf32>
    %3 = arith.mulf %0, %2 : vector<8x128xf32>
    %c0_3 = arith.constant 0 : index
    %c0_4 = arith.constant 0 : index
    %4 = vector.load %arg3[%c0_3, %c0_4] : memref<1x128xf32, #tpu.memory_space<vmem>>, vector<1x128xf32>
    %5 = vector.broadcast %4 : vector<1x128xf32> to vector<8x128xf32>
    %6 = arith.addf %3, %5 : vector<8x128xf32>
    %c0_5 = arith.constant 0 : index
    %c0_6 = arith.constant 0 : index
    %7 = vector.load %arg4[%c0_5, %c0_6] : memref<8x128xf32, #tpu.memory_space<vmem>>, vector<8x128xf32>
    tpu.vector_store %arg4[%c0_5, %c0_6], %6 {strides = array<i32>} : memref<8x128xf32, #tpu.memory_space<vmem>>, vector<8x128xf32>,
    return
  }
  func.func @transform_0(%arg0: i32) -> (i32, i32) {
    %c0_i32 = arith.constant 0 : i32
    %c0_i32_0 = arith.constant 0 : i32
    return %arg0, %c0_i32 : i32, i32
  }
  func.func @transform_1(%arg0: i32) -> (i32, i32) {
    %c0_i32 = arith.constant 0 : i32
    %c0_i32_0 = arith.constant 0 : i32
    %c0_i32_1 = arith.constant 0 : i32
    return %c0_i32, %c0_i32_0 : i32, i32
  }
  func.func @transform_2(%arg0: i32) -> (i32, i32) {
    %c0_i32 = arith.constant 0 : i32
    %c0_i32_0 = arith.constant 0 : i32
    %c0_i32_1 = arith.constant 0 : i32
    return %c0_i32, %c0_i32_0 : i32, i32
  }
  func.func @transform_3(%arg0: i32) -> (i32, i32) {
    %c0_i32 = arith.constant 0 : i32
    %c0_i32_0 = arith.constant 0 : i32
    return %arg0, %c0_i32 : i32, i32
  }
}

</mosaic_0001>

<bundles_post_ra>
// kernel: gcn_layer.3
= control target key start
LH: loop header
LB: loop body
LE: loop exit
PB: predicated region body
PF: predicated region fallthrough
CT: control target
= control target key end

     0   :  { %s70_s0 = inlined_call_operand.vmem [shape: f32[8,128], index: 0, kind: input, shape index: {}, may-alias: {0,3}]   ;;  %s71_s1 = inlined_call_operand.vmem [shape: f32[1,128], index: 1, kind: input, shape index: {}]   ;;  %s72_s2 = inlined_call_operand.vmem [shape: f32[1,128], index: 2, kind: input, shape index: {}]   ;;  %s73_s3 = inlined_call_operand.vmem [shape: f32[8,128], index: 3, kind: output, shape index: {}, may-alias: {0,3}]  }
   0x1   :  { %v14_v0 = vld [vmem:[%s70_s0] sm:$0xff] }
   0x2   :  { %v36_v1 = vld [vmem:[%s71_s1] ss:$0 sm:$0xff] }
   0x3   :  { %v37_v2 = vld [vmem:[%s72_s2] ss:$0 sm:$0xff]  ;;  %v22_v3 = vmul.f32 %v36_v1, %v14_v0 }
   0x5   :  { %v30_v4 = vadd.f32 %v37_v2, %v22_v3 }
   0x7   :  { %31 = vst [vmem:[%s73_s3] sm:$0xff] %v30_v4 }

// kernel: gcn_layer.2
= control target key start
LH: loop header
LB: loop body
LE: loop exit
PB: predicated region body
PF: predicated region fallthrough
CT: control target
= control target key end

     0   :  { %v331_v0 = vmov 0.0   ;;  %vm332_vm0 = vmmov 0   ;;  %s500_s1 = inlined_call_operand.vmem [shape: f32[128,128], index: 1, kind: input, shape index: {}]   ;;  %s501_s2 = inlined_call_operand.vmem [shape: f32[128,128], index: 2, kind: input, shape index: {}]   ;;  %s502_s0 = inlined_call_operand.vmem [shape: f32[8,128], index: 0, kind: input, shape index: {}]   ;;  %s503_s3 = inlined_call_operand.vmem [shape: f32[8,128], index: 3, kind: output, shape index: {0}]   ;;  %s504_s4 = inlined_call_operand.vmem [shape: f32[1,2,128], index: 4, kind: output, shape index: {1}]  }
   0x1   :  { %259 = vmatprep.subr.mxu0 %v331_v0  ;;  %v38_v1 = vld [vmem:[%s500_s1 + $0x78] sm:$0xff]  ;;  %v37_v2 = vld [vmem:[%s500_s1 + $0x70] sm:$0xff]  ;;  %291 = vmatprep.mubr.msk.f32.mxu0 %vm332_vm0, %v331_v0  ;;  %v36_v3 = vld [vmem:[%s500_s1 + $0x68] sm:$0xff] }
   0x2   :  { %260 = vmatpush3.msra.mxu0 %v38_v1  ;;  %294 = vmatprep.subr.mxu1 %v331_v0  ;;  %v35_v4 = vld [vmem:[%s500_s1 + $0x60] sm:$0xff]  ;;  %v130_v5 = vld [vmem:[%s501_s2 + $0x78] sm:$0xff]  ;;  %v129_v7 = vld [vmem:[%s501_s2 + $0x70] sm:$0xff] }
   0x3   :  { %261 = vmatprep.subr.mxu0 %v331_v0  ;;  %326 = vmatprep.mubr.msk.f32.mxu1 %vm332_vm0, %v331_v0  ;;  %v34_v6 = vld [vmem:[%s500_s1 + $0x58] sm:$0xff]  ;;  %v128_v8 = vld [vmem:[%s501_s2 + $0x68] sm:$0xff]  ;;  %v33_v9 = vld [vmem:[%s500_s1 + $0x50] sm:$0xff] }
   0x4   :  { %262 = vmatpush3.msra.mxu0 %v37_v2  ;;  %295 = vmatpush3.msra.mxu1 %v130_v5  ;;  %v127_v10 = vld [vmem:[%s501_s2 + $0x60] sm:$0xff]  ;;  %v32_v11 = vld [vmem:[%s500_s1 + $0x48] sm:$0xff]  ;;  %v126_v12 = vld [vmem:[%s501_s2 + $0x58] sm:$0xff] }
   0x5   :  { %263 = vmatprep.subr.mxu0 %v331_v0  ;;  %296 = vmatprep.subr.mxu1 %v331_v0  ;;  %v31_v13 = vld [vmem:[%s500_s1 + $0x40] sm:$0xff]  ;;  %v125_v14 = vld [vmem:[%s501_s2 + $0x50] sm:$0xff]  ;;  %v30_v15 = vld [vmem:[%s500_s1 + $0x38] sm:$0xff] }
   0x6   :  { %264 = vmatpush3.msra.mxu0 %v36_v3  ;;  %297 = vmatpush3.msra.mxu1 %v129_v7  ;;  %v124_v16 = vld [vmem:[%s501_s2 + $0x48] sm:$0xff]  ;;  %v29_v17 = vld [vmem:[%s500_s1 + $0x30] sm:$0xff]  ;;  %v123_v18 = vld [vmem:[%s501_s2 + $0x40] sm:$0xff] }
   0x7   :  { %265 = vmatprep.subr.mxu0 %v331_v0  ;;  %298 = vmatprep.subr.mxu1 %v331_v0  ;;  %v28_v19 = vld [vmem:[%s500_s1 + $0x28] sm:$0xff]  ;;  %v122_v20 = vld [vmem:[%s501_s2 + $0x38] sm:$0xff]  ;;  %v27_v21 = vld [vmem:[%s500_s1 + $0x20] sm:$0xff] }
   0x8   :  { %266 = vmatpush3.msra.mxu0 %v35_v4  ;;  %299 = vmatpush3.msra.mxu1 %v128_v8  ;;  %v121_v22 = vld [vmem:[%s501_s2 + $0x30] sm:$0xff]  ;;  %v26_v23 = vld [vmem:[%s500_s1 + $0x18] sm:$0xff]  ;;  %v120_v24 = vld [vmem:[%s501_s2 + $0x28] sm:$0xff] }
   0x9   :  { %267 = vmatprep.subr.mxu0 %v331_v0  ;;  %300 = vmatprep.subr.mxu1 %v331_v0  ;;  %v25_v25 = vld [vmem:[%s500_s1 + $0x10] sm:$0xff]  ;;  %v119_v26 = vld [vmem:[%s501_s2 + $0x20] sm:$0xff]  ;;  %v24_v27 = vld [vmem:[%s500_s1 + $0x8] sm:$0xff] }
   0xa   :  { %268 = vmatpush3.msra.mxu0 %v34_v6  ;;  %301 = vmatpush3.msra.mxu1 %v127_v10  ;;  %v118_v28 = vld [vmem:[%s501_s2 + $0x18] sm:$0xff]  ;;  %v23_v29 = vld [vmem:[%s500_s1] sm:$0xff]  ;;  %v117_v31 = vld [vmem:[%s501_s2 + $0x10] sm:$0xff] }
   0xb   :  { %269 = vmatprep.subr.mxu0 %v331_v0  ;;  %302 = vmatprep.subr.mxu1 %v331_v0  ;;  %v22_v30 = vld [vmem:[%s502_s0] sm:$0xff]  ;;  %v116_v32 = vld [vmem:[%s501_s2 + $0x8] sm:$0xff] }
   0xc   :  { %270 = vmatpush3.msra.mxu0 %v33_v9  ;;  %303 = vmatpush3.msra.mxu1 %v126_v12  ;;  %v115_v33 = vld [vmem:[%s501_s2] sm:$0xff] }
   0xd   :  { %271 = vmatprep.subr.mxu0 %v331_v0  ;;  %304 = vmatprep.subr.mxu1 %v331_v0 }
   0xe   :  { %272 = vmatpush3.msra.mxu0 %v32_v11  ;;  %305 = vmatpush3.msra.mxu1 %v125_v14 }
   0xf   :  { %273 = vmatprep.subr.mxu0 %v331_v0  ;;  %306 = vmatprep.subr.mxu1 %v331_v0 }
  0x10   :  { %274 = vmatpush3.msra.mxu0 %v31_v13  ;;  %307 = vmatpush3.msra.mxu1 %v124_v16 }
  0x11   :  { %275 = vmatprep.subr.mxu0 %v331_v0  ;;  %308 = vmatprep.subr.mxu1 %v331_v0 }
  0x12   :  { %276 = vmatpush3.msra.mxu0 %v30_v15  ;;  %309 = vmatpush3.msra.mxu1 %v123_v18 }
  0x13   :  { %277 = vmatprep.subr.mxu0 %v331_v0  ;;  %310 = vmatprep.subr.mxu1 %v331_v0 }
  0x14   :  { %278 = vmatpush3.msra.mxu0 %v29_v17  ;;  %311 = vmatpush3.msra.mxu1 %v122_v20 }
  0x15   :  { %279 = vmatprep.subr.mxu0 %v331_v0  ;;  %312 = vmatprep.subr.mxu1 %v331_v0 }
  0x16   :  { %280 = vmatpush3.msra.mxu0 %v28_v19  ;;  %313 = vmatpush3.msra.mxu1 %v121_v22 }
  0x17   :  { %281 = vmatprep.subr.mxu0 %v331_v0  ;;  %314 = vmatprep.subr.mxu1 %v331_v0 }
  0x18   :  { %282 = vmatpush3.msra.mxu0 %v27_v21  ;;  %315 = vmatpush3.msra.mxu1 %v120_v24 }
  0x19   :  { %283 = vmatprep.subr.mxu0 %v331_v0  ;;  %316 = vmatprep.subr.mxu1 %v331_v0 }
  0x1a   :  { %284 = vmatpush3.msra.mxu0 %v26_v23  ;;  %317 = vmatpush3.msra.mxu1 %v119_v26 }
  0x1b   :  { %285 = vmatprep.subr.mxu0 %v331_v0  ;;  %318 = vmatprep.subr.mxu1 %v331_v0 }
  0x1c   :  { %286 = vmatpush3.msra.mxu0 %v25_v25  ;;  %319 = vmatpush3.msra.mxu1 %v118_v28 }
  0x1d   :  { %287 = vmatprep.subr.mxu0 %v331_v0  ;;  %320 = vmatprep.subr.mxu1 %v331_v0 }
  0x1e   :  { %288 = vmatpush3.msra.mxu0 %v24_v27  ;;  %321 = vmatpush3.msra.mxu1 %v117_v31 }
  0x1f   :  { %289 = vmatprep.subr.mxu0 %v331_v0  ;;  %322 = vmatprep.subr.mxu1 %v331_v0 }
  0x20   :  { %290 = vmatpush3.msra.mxu0 %v23_v29  ;;  %323 = vmatpush3.msra.mxu1 %v116_v32 }
  0x21   :  { %292 = vmatmul.mubr.f32.vlgmr.msra.gmra.mxu0 %v22_v30  ;;  %324 = vmatprep.subr.mxu1 %v331_v0 }
  0x22   :  { %325 = vmatpush3.msra.mxu1 %v115_v33 }
  0xe1   :  { %v105_v34 = vpop.f32.mrf.mxu0 }
  0xe2   :  { %327 = vmatmul.mubr.f32.vlgmr.msra.gmra.mxu1 %v105_v34 }
  0xe3   :  { %v293_v35 = vpop.f32.mrf.mxu0 }
 0x1a2   :  { %v197_v36 = vpop.f32.mrf.mxu1 }
 0x1a3   :  { %201 = vst [vmem:[%s503_s3] sm:$0xff] %v197_v36  ;;  %v202_v37 = vrot.slane %v197_v36, 4  ;;  %v209_v38 = vmul.f32 %v197_v36, %v197_v36 }
 0x1a4   :  { %v328_v39 = vpop.f32.mrf.mxu1 }
 0x1a5   :  { %v203_v40 = vadd.f32 %v202_v37, %v197_v36  ;;  %v210_v41 = vrot.slane %v209_v38, 4 }
 0x1a7   :  { %v204_v42 = vrot.slane %v203_v40, 2  ;;  %v211_v43 = vadd.f32 %v210_v41, %v209_v38 }
 0x1a9   :  { %v205_v44 = vadd.f32 %v204_v42, %v203_v40  ;;  %v212_v45 = vrot.slane %v211_v43, 2 }
 0x1ab   :  { %v206_v46 = vrot.slane %v205_v44, 1  ;;  %v213_v47 = vadd.f32 %v212_v45, %v211_v43 }
 0x1ad   :  { %v207_v48 = vadd.f32 %v206_v46, %v205_v44  ;;  %v214_v49 = vrot.slane %v213_v47, 1 }
 0x1af   :  { %208 = vst [vmem:[%s504_s4] sm:$0x1] %v207_v48  ;;  %v215_v50 = vadd.f32 %v214_v49, %v213_v47 }
 0x1b1   :  { %216 = vst [vmem:[%s504_s4 + $0x1] sm:$0x1] %v215_v50 }

</bundles_post_ra>
